<compile_context>
chip_gen: v6e
topology: v6e:2x2x1
jax: 0.10.0
libtpu: 0.0.40
codegen_flags: <defaults>
</compile_context>

<pallas_src>
import functools

import jax
import jax.numpy as jnp
from jax.experimental import pallas as pl
from jax.experimental.pallas import tpu as pltpu


def _round_up(n, m):
    return ((n + m - 1) // m) * m


def _mlp_kernel(x_ref, w1_ref, b1_ref, w2_ref, b2_ref, w3_ref, b3_ref, o_ref):
    # x_ref:  (bm, Dp)  f32 batch tile (features zero-padded to Dp)
    # w1_ref: (Dp, 256), b1_ref: (1, 256)
    # w2_ref: (256, 128), b2_ref: (1, 128)
    # w3_ref: (1, 128) fc3 weight kept as a lane row (no N=1 MXU matmul)
    # b3_ref: (1, 1)
    # o_ref:  (1, 1, bm) lane-dense output tile
    x = x_ref[...]

    # fc1 + ReLU (MXU, f32 accumulation). Zero-padded feature columns of x and
    # zero-padded rows of W1^T contribute 0 to the contraction.
    h1 = jnp.dot(x, w1_ref[...], preferred_element_type=jnp.float32) + b1_ref[...]
    h1 = jnp.maximum(h1, 0.0)

    # fc2 + ReLU (MXU)
    h2 = jnp.dot(h1, w2_ref[...], preferred_element_type=jnp.float32) + b2_ref[...]
    h2 = jnp.maximum(h2, 0.0)

    # fc3: single output unit -> VPU multiply + XLU lane reduction keeps the
    # MXU free and composes with the lane-dense output store.
    logits = jnp.sum(h2 * w3_ref[...], axis=-1, keepdims=True) + b3_ref[...]  # (bm, 1)
    scores = jax.nn.sigmoid(logits) * 360.0                                   # (bm, 1)

    # Lane-dense store: (bm, 1) column -> (1, 1, bm) row (sublane->lane
    # relayout rides the otherwise-idle XLU slot).
    bm = o_ref.shape[-1]
    o_ref[...] = scores.reshape(1, 1, bm).astype(o_ref.dtype)


def prepare_params(w1, b1, w2, b2, w3, b3):
    """One-time glue outside the hot path: PyTorch (out,in) -> (in,out) and
    zero-pad the input feature dim up to a multiple of 128."""
    w1 = jnp.asarray(w1, jnp.float32)
    d = w1.shape[1]
    dp = _round_up(d, 128)
    w1t = jnp.pad(w1.T, ((0, dp - d), (0, 0)))            # (Dp, 256)
    b1r = jnp.asarray(b1, jnp.float32).reshape(1, -1)      # (1, 256)
    w2t = jnp.asarray(w2, jnp.float32).T                   # (256, 128)
    b2r = jnp.asarray(b2, jnp.float32).reshape(1, -1)      # (1, 128)
    w3r = jnp.asarray(w3, jnp.float32).reshape(1, -1)      # (1, 128) row
    b3r = jnp.asarray(b3, jnp.float32).reshape(1, 1)       # (1, 1)
    return w1t, b1r, w2t, b2r, w3r, b3r


@functools.partial(jax.jit, static_argnames=("block_m",))
def grasp_score_predictor(x, w1t, b1r, w2t, b2r, w3r, b3r, block_m=256):
    """Forward pass of GraspScorePredictor.

    x: (B, input_dim) float32; params from prepare_params().
    Returns (B, 1) float32 scores in (0, 360).
    """
    B, D = x.shape
    Dp, H1 = w1t.shape          # (padded input dim, 256)
    H2 = w2t.shape[1]           # 128
    x = x.astype(jnp.float32)

    # Tile the batch: pad B to a multiple of the (sublane-aligned) tile. For
    # large B this keeps >= 2 grid steps so "parallel" can shard across
    # TensorCores (v7x); for tiny demo batches the tile shrinks to fit.
    bm = min(block_m, _round_up(B, 8))
    Bp = _round_up(B, bm)
    grid_m = Bp // bm

    xp = jnp.pad(x, ((0, Bp - B), (0, Dp - D)))   # zero rows/cols are harmless

    cost = pl.CostEstimate(
        flops=2 * Bp * (Dp * H1 + H1 * H2 + H2),
        transcendentals=Bp,                        # one sigmoid per row
        bytes_accessed=4 * (Bp * Dp + Dp * H1 + H1 * H2
                            + H1 + 2 * H2 + 1 + Bp),
    )

    out = pl.pallas_call(
        _mlp_kernel,
        out_shape=jax.ShapeDtypeStruct((grid_m, 1, bm), jnp.float32),
        grid_spec=pltpu.PrefetchScalarGridSpec(
            num_scalar_prefetch=0,
            grid=(grid_m,),
            in_specs=[
                pl.BlockSpec((bm, Dp), lambda i: (i, 0)),    # x tile
                pl.BlockSpec((Dp, H1), lambda i: (0, 0)),    # W1^T (resident)
                pl.BlockSpec((1, H1), lambda i: (0, 0)),     # b1
                pl.BlockSpec((H1, H2), lambda i: (0, 0)),    # W2^T (resident)
                pl.BlockSpec((1, H2), lambda i: (0, 0)),     # b2
                pl.BlockSpec((1, H2), lambda i: (0, 0)),     # W3 row
                pl.BlockSpec((1, 1), lambda i: (0, 0)),      # b3
            ],
            out_specs=pl.BlockSpec((1, 1, bm), lambda i: (i, 0, 0)),
        ),
        compiler_params=pltpu.CompilerParams(
            dimension_semantics=("parallel",),
        ),
        cost_estimate=cost,
    )(xp, w1t, b1r, w2t, b2r, w3r, b3r)

    # (grid_m, 1, bm) row-major == padded batch order; drop padded rows.
    return out.reshape(Bp, 1)[:B]


def _reference(x, w1, b1, w2, b2, w3, b3):
    h1 = jnp.maximum(x @ w1.T + b1, 0.0)
    h2 = jnp.maximum(h1 @ w2.T + b2, 0.0)
    return jax.nn.sigmoid(h2 @ w3.T + b3) * 360.0


if __name__ == "__main__":
    key = jax.random.PRNGKey(0)
    k_x, k_w1, k_b1, k_w2, k_b2, k_w3, k_b3 = jax.random.split(key, 7)

    batch = 8
    input_dim = 32

    # Deterministic synthetic parameters (PyTorch nn.Linear shapes).
    x = jax.random.normal(k_x, (batch, input_dim), dtype=jnp.float32)
    w1 = jax.random.normal(k_w1, (256, input_dim), dtype=jnp.float32) * 0.05
    b1 = jax.random.normal(k_b1, (256,), dtype=jnp.float32) * 0.05
    w2 = jax.random.normal(k_w2, (128, 256), dtype=jnp.float32) * 0.05
    b2 = jax.random.normal(k_b2, (128,), dtype=jnp.float32) * 0.05
    w3 = jax.random.normal(k_w3, (1, 128), dtype=jnp.float32) * 0.05
    b3 = jax.random.normal(k_b3, (1,), dtype=jnp.float32) * 0.05

    params = prepare_params(w1, b1, w2, b2, w3, b3)

    out = grasp_score_predictor(x, *params)
    out = jax.block_until_ready(out)
    ref = _reference(x, w1, b1, w2, b2, w3, b3)
    assert out.shape == (batch, 1)
    assert jnp.allclose(out, ref, atol=1e-3, rtol=1e-3), "mismatch vs reference"

    # Non-multiple batch exercises the padding + slice-off path.
    x_odd = jax.random.normal(k_x, (5, input_dim), dtype=jnp.float32)
    out_odd = jax.block_until_ready(grasp_score_predictor(x_odd, *params))
    ref_odd = _reference(x_odd, w1, b1, w2, b2, w3, b3)
    assert out_odd.shape == (5, 1)
    assert jnp.allclose(out_odd, ref_odd, atol=1e-3, rtol=1e-3), "mismatch (padded batch)"

    print("KERNEL_OK")
</pallas_src>

<mosaic_0001>
module attributes {stable_mosaic.version = 11 : i64} {
  func.func @_mlp_kernel(%arg0: i32, %arg1: memref<8x128xf32, #tpu.memory_space<vmem>>, %arg2: memref<128x256xf32, #tpu.memory_space<vmem>>, %arg3: memref<1x256xf32, #tpu.memory_space<vmem>>, %arg4: memref<256x128xf32, #tpu.memory_space<vmem>>, %arg5: memref<1x128xf32, #tpu.memory_space<vmem>>, %arg6: memref<1x128xf32, #tpu.memory_space<vmem>>, %arg7: memref<1x1xf32, #tpu.memory_space<vmem>>, %arg8: memref<1x1x8xf32, #tpu.memory_space<vmem>>) attributes {dimension_semantics = [#tpu.dimension_semantics<parallel>], iteration_bounds = array<i64: 1>, scalar_prefetch = 0 : i64, scratch_operands = 0 : i64, tpu.core_type = #tpu.core_type<tc>, window_params = [{transform_indices = @transform_0, window_bounds = array<i64: 8, 128>}, {pipeline_mode = #tpu.pipeline_mode<synchronous>, transform_indices = @transform_1, window_bounds = array<i64: 128, 256>}, {pipeline_mode = #tpu.pipeline_mode<synchronous>, transform_indices = @transform_2, window_bounds = array<i64: 1, 256>}, {pipeline_mode = #tpu.pipeline_mode<synchronous>, transform_indices = @transform_3, window_bounds = array<i64: 256, 128>}, {pipeline_mode = #tpu.pipeline_mode<synchronous>, transform_indices = @transform_4, window_bounds = array<i64: 1, 128>}, {pipeline_mode = #tpu.pipeline_mode<synchronous>, transform_indices = @transform_5, window_bounds = array<i64: 1, 128>}, {pipeline_mode = #tpu.pipeline_mode<synchronous>, transform_indices = @transform_6, window_bounds = array<i64: 1, 1>}, {transform_indices = @transform_7, window_bounds = array<i64: 1, 1, 8>}]} {
    %c0 = arith.constant 0 : index
    %c0_0 = arith.constant 0 : index
    %0 = vector.load %arg1[%c0, %c0_0] : memref<8x128xf32, #tpu.memory_space<vmem>>, vector<8x128xf32>
    %c0_1 = arith.constant 0 : index
    %c0_2 = arith.constant 0 : index
    %1 = vector.load %arg2[%c0_1, %c0_2] : memref<128x256xf32, #tpu.memory_space<vmem>>, vector<128x256xf32>
    %cst = arith.constant dense<0.000000e+00> : vector<8x256xf32>
    %2 = tpu.matmul %0, %1, %cst {dimension_numbers = #tpu.dot_dimension_numbers<[1], [0], [0], [1], [0, 0, 1, 1], [], []>} : vector<8x128xf32>, vector<128x256xf32>, vector<8x256xf32> -> vector<8x256xf32>
    %c0_3 = arith.constant 0 : index
    %c0_4 = arith.constant 0 : index
    %3 = vector.load %arg3[%c0_3, %c0_4] : memref<1x256xf32, #tpu.memory_space<vmem>>, vector<1x256xf32>
    %4 = vector.broadcast %3 : vector<1x256xf32> to vector<8x256xf32>
    %5 = arith.addf %2, %4 : vector<8x256xf32>
    %cst_5 = arith.constant 0.000000e+00 : f32
    %6 = vector.broadcast %cst_5 : f32 to vector<8x256xf32>
    %7 = arith.maximumf %5, %6 : vector<8x256xf32>
    %c0_6 = arith.constant 0 : index
    %c0_7 = arith.constant 0 : index
    %8 = vector.load %arg4[%c0_6, %c0_7] : memref<256x128xf32, #tpu.memory_space<vmem>>, vector<256x128xf32>
    %cst_8 = arith.constant dense<0.000000e+00> : vector<8x128xf32>
    %9 = tpu.matmul %7, %8, %cst_8 {dimension_numbers = #tpu.dot_dimension_numbers<[1], [0], [0], [1], [0, 0, 1, 1], [], []>} : vector<8x256xf32>, vector<256x128xf32>, vector<8x128xf32> -> vector<8x128xf32>
    %c0_9 = arith.constant 0 : index
    %c0_10 = arith.constant 0 : index
    %10 = vector.load %arg5[%c0_9, %c0_10] : memref<1x128xf32, #tpu.memory_space<vmem>>, vector<1x128xf32>
    %11 = vector.broadcast %10 : vector<1x128xf32> to vector<8x128xf32>
    %12 = arith.addf %9, %11 : vector<8x128xf32>
    %cst_11 = arith.constant 0.000000e+00 : f32
    %13 = vector.broadcast %cst_11 : f32 to vector<8x128xf32>
    %14 = arith.maximumf %12, %13 : vector<8x128xf32>
    %c0_12 = arith.constant 0 : index
    %c0_13 = arith.constant 0 : index
    %15 = vector.load %arg6[%c0_12, %c0_13] : memref<1x128xf32, #tpu.memory_space<vmem>>, vector<1x128xf32>
    %16 = vector.broadcast %15 : vector<1x128xf32> to vector<8x128xf32>
    %17 = arith.mulf %14, %16 : vector<8x128xf32>
    %cst_14 = arith.constant dense<0.000000e+00> : vector<8xf32>
    %18 = vector.multi_reduction <add>, %17, %cst_14 [1] : vector<8x128xf32> to vector<8xf32>
    %19 = vector.shape_cast %18 : vector<8xf32> to vector<8x1xf32>
    %c0_15 = arith.constant 0 : index
    %c0_16 = arith.constant 0 : index
    %20 = vector.load %arg7[%c0_15, %c0_16] : memref<1x1xf32, #tpu.memory_space<vmem>>, vector<1x1xf32>
    %21 = vector.broadcast %20 : vector<1x1xf32> to vector<8x1xf32>
    %22 = arith.addf %19, %21 : vector<8x1xf32>
    %23 = arith.negf %22 : vector<8x1xf32>
    %24 = math.exp %23 : vector<8x1xf32>
    %cst_17 = arith.constant 1.000000e+00 : f32
    %25 = vector.broadcast %cst_17 : f32 to vector<8x1xf32>
    %26 = arith.addf %25, %24 : vector<8x1xf32>
    %27 = arith.divf %25, %26 : vector<8x1xf32>
    %cst_18 = arith.constant 3.600000e+02 : f32
    %28 = vector.broadcast %cst_18 : f32 to vector<8x1xf32>
    %29 = arith.mulf %27, %28 : vector<8x1xf32>
    %30 = vector.shape_cast %29 : vector<8x1xf32> to vector<1x1x8xf32>
    %c0_19 = arith.constant 0 : index
    %c0_20 = arith.constant 0 : index
    %c0_21 = arith.constant 0 : index
    %31 = vector.load %arg8[%c0_19, %c0_20, %c0_21] : memref<1x1x8xf32, #tpu.memory_space<vmem>>, vector<1x1x8xf32>
    tpu.vector_store %arg8[%c0_19, %c0_20, %c0_21], %30 {strides = array<i32>} : memref<1x1x8xf32, #tpu.memory_space<vmem>>, vector<1x1x8xf32>,
    return
  }
  func.func @transform_0(%arg0: i32) -> (i32, i32) {
    %c0_i32 = arith.constant 0 : i32
    %c0_i32_0 = arith.constant 0 : i32
    return %arg0, %c0_i32 : i32, i32
  }
  func.func @transform_1(%arg0: i32) -> (i32, i32) {
    %c0_i32 = arith.constant 0 : i32
    %c0_i32_0 = arith.constant 0 : i32
    %c0_i32_1 = arith.constant 0 : i32
    return %c0_i32, %c0_i32_0 : i32, i32
  }
  func.func @transform_2(%arg0: i32) -> (i32, i32) {
    %c0_i32 = arith.constant 0 : i32
    %c0_i32_0 = arith.constant 0 : i32
    %c0_i32_1 = arith.constant 0 : i32
    return %c0_i32, %c0_i32_0 : i32, i32
  }
  func.func @transform_3(%arg0: i32) -> (i32, i32) {
    %c0_i32 = arith.constant 0 : i32
    %c0_i32_0 = arith.constant 0 : i32
    %c0_i32_1 = arith.constant 0 : i32
    return %c0_i32, %c0_i32_0 : i32, i32
  }
  func.func @transform_4(%arg0: i32) -> (i32, i32) {
    %c0_i32 = arith.constant 0 : i32
    %c0_i32_0 = arith.constant 0 : i32
    %c0_i32_1 = arith.constant 0 : i32
    return %c0_i32, %c0_i32_0 : i32, i32
  }
  func.func @transform_5(%arg0: i32) -> (i32, i32) {
    %c0_i32 = arith.constant 0 : i32
    %c0_i32_0 = arith.constant 0 : i32
    %c0_i32_1 = arith.constant 0 : i32
    return %c0_i32, %c0_i32_0 : i32, i32
  }
  func.func @transform_6(%arg0: i32) -> (i32, i32) {
    %c0_i32 = arith.constant 0 : i32
    %c0_i32_0 = arith.constant 0 : i32
    %c0_i32_1 = arith.constant 0 : i32
    return %c0_i32, %c0_i32_0 : i32, i32
  }
  func.func @transform_7(%arg0: i32) -> (i32, i32, i32) {
    %c0_i32 = arith.constant 0 : i32
    %c0_i32_0 = arith.constant 0 : i32
    %c0_i32_1 = arith.constant 0 : i32
    return %arg0, %c0_i32, %c0_i32_0 : i32, i32, i32
  }
}

</mosaic_0001>

<bundles_post_ra>
// kernel: grasp_score_predictor.1
= control target key start
LH: loop header
LB: loop body
LE: loop exit
PB: predicated region body
PF: predicated region fallthrough
CT: control target
= control target key end

     0   :  { %s531_s0 = inlined_call_operand.vmem [shape: f32[8,128], index: 0, kind: input, shape index: {}]   ;;  %s532_s1 = inlined_call_operand.hbm [shape: f32[128,256], index: 1, kind: input, shape index: {}]   ;;  %s533_s2 = inlined_call_operand.vmem [shape: f32[1,256], index: 2, kind: input, shape index: {}]   ;;  %s534_s3 = inlined_call_operand.hbm [shape: f32[256,128], index: 3, kind: input, shape index: {}]   ;;  %s535_s4 = inlined_call_operand.vmem [shape: f32[1,128], index: 4, kind: input, shape index: {}]   ;;  %s536_s5 = inlined_call_operand.vmem [shape: f32[1,128], index: 5, kind: input, shape index: {}]   ;;  %s537_s6 = inlined_call_operand.<no memory space> [shape: f32[1,1], index: 6, kind: input, shape index: {}]   ;;  %s538_s7 = inlined_call_operand.hbm [shape: f32[1,1,8], index: 7, kind: output, shape index: {}]  }
   0x1   :  { %v12_v0 = vstv %s537_s6 }
   0x2   :  { %13 = vst [vmem:[#allocation2] sm:$0x1] %v12_v0 }
   0x3   :  { %14 = vsyncpa [#allocation4], 0 }
   0x4   :  { %15 = vsyncpa [#allocation7], 0 }
   0x5   :  { %16 = vsyncpa [#allocation5], 0  ;;  %s458_s26 = smov [#allocation3]  }
   0x6   :  { %s24_s27 = sshll.u32 %s458_s26, 4  ;;  %s25_s27 = int_to_ptr.vmem [resolvable:$true] %s24_s27 }
   0x7   :  { %s400_s28 = scalar_lea.vmem %s25_s27, 4096  ;;  %p405_p1 = scmp.lt.s32.totalorder %s25_s27, %s25_s27 }
   0x8   :  { %p401_p0 = scmp.ne.s32.totalorder %s25_s27, %s400_s28  ;;  %p406_p2 = scmp.lt.s32.totalorder %s400_s28, %s400_s28 }
   0xa   :  { %p407_p3 = por %p406_p2, %p405_p1 }
   0xc   :  { %p408_p4 = pnand %p407_p3, %p401_p0 }
   0xe   :  { %411 = shalt.err (!%p408_p4)
}
   0xf   :  { %s459_s29 = smov 256   ;;  %s460_s30 = smov 16  }
  0x10   :  { %30 = dma.hbm_to_vmem [thread:$0]  %s532_s1, 4096, %s25_s27, [#allocation4], %s459_s29, %s459_s29, %s460_s30  }
  0x11   :  { %s461_s6 = smov [#allocation6]  }
  0x12   :  { %s38_s10 = sshll.u32 %s461_s6, 4  ;;  %s39_s10 = int_to_ptr.vmem [resolvable:$true] %s38_s10 }
  0x13   :  { %s420_s11 = scalar_lea.vmem %s39_s10, 4096  ;;  %p425_p6 = scmp.lt.s32.totalorder %s39_s10, %s39_s10 }
  0x14   :  { %p421_p5 = scmp.ne.s32.totalorder %s39_s10, %s420_s11  ;;  %p426_p7 = scmp.lt.s32.totalorder %s420_s11, %s420_s11 }
  0x16   :  { %p427_p8 = por %p426_p7, %p425_p6 }
  0x18   :  { %p428_p9 = pnand %p427_p8, %p421_p5 }
  0x1a   :  { %431 = shalt.err (!%p428_p9)
}
  0x1b   :  { %s462_s12 = smov 128   ;;  %s463_s13 = smov 8  }
  0x1c   :  { %44 = dma.hbm_to_vmem [thread:$0]  %s534_s3, 4096, %s39_s10, [#allocation7], %s462_s12, %s462_s12, %s463_s13  }
  0x1d   :  { %452 = dma.done.wait [#allocation4], 4096  }
  0x1e   :  { %453 = vsyncadd [#allocation4], 4294963200 }
  0x1f   :  { %454 = dma.done.wait [#allocation7], 4096  }
  0x20   :  { %455 = vsyncadd [#allocation7], 4294963200  ;;  %v464_v1 = vmov 0.0   ;;  %v89_v2 = vld [vmem:[#allocation3 + $0xf8] sm:$0xff]  ;;  %v88_v3 = vld [vmem:[#allocation3 + $0xf0] sm:$0xff]  ;;  %vm321_vm0 = vcmask 57344  }
  0x21   :  { %166 = vmatprep.mubr.f32.mxu0 %v464_v1  ;;  %v87_v4 = vld [vmem:[#allocation3 + $0xe8] sm:$0xff]  ;;  %102 = vmatprep.subr.mxu0 %v89_v2  ;;  %v86_v5 = vld [vmem:[#allocation3 + $0xe0] sm:$0xff]  ;;  %v85_v6 = vld [vmem:[#allocation3 + $0xd8] sm:$0xff] }
  0x22   :  { %103 = vmatpush1.msra.mxu0 %v88_v3  ;;  %v84_v7 = vld [vmem:[#allocation3 + $0xd0] sm:$0xff]  ;;  %v83_v8 = vld [vmem:[#allocation3 + $0xc8] sm:$0xff]  ;;  %v82_v9 = vld [vmem:[#allocation3 + $0xc0] sm:$0xff]  ;;  %v92_v3 = vlaneseq }
  0x23   :  { %104 = vmatprep.subr.mxu0 %v87_v4  ;;  %v81_v10 = vld [vmem:[#allocation3 + $0xb8] sm:$0xff]  ;;  %v80_v11 = vld [vmem:[#allocation3 + $0xb0] sm:$0xff]  ;;  %v79_v12 = vld [vmem:[#allocation3 + $0xa8] sm:$0xff] }
  0x24   :  { %105 = vmatpush1.msra.mxu0 %v86_v5  ;;  %v78_v13 = vld [vmem:[#allocation3 + $0xa0] sm:$0xff]  ;;  %v77_v14 = vld [vmem:[#allocation3 + $0x98] sm:$0xff]  ;;  %v76_v15 = vld [vmem:[#allocation3 + $0x90] sm:$0xff]  ;;  %v93_v4 = vshrl.u32 %v92_v3, 7 }
  0x25   :  { %106 = vmatprep.subr.mxu0 %v85_v6  ;;  %v206_v16 = vld [vmem:[#allocation6 + $0xf8] sm:$0xff]  ;;  %v205_v18 = vld [vmem:[#allocation6 + $0xf0] sm:$0xff]  ;;  %v75_v19 = vld [vmem:[#allocation3 + $0x88] sm:$0xff] }
  0x26   :  { %107 = vmatpush1.msra.mxu0 %v84_v7  ;;  %v190_v17 = vld [vmem:[#allocation6 + $0x78] sm:$0xff]  ;;  %343 = vmatprep.subr.mxu1 %v206_v16  ;;  %v189_v20 = vld [vmem:[#allocation6 + $0x70] sm:$0xff]  ;;  %v74_v21 = vld [vmem:[#allocation3 + $0x80] sm:$0xff]  ;;  %v94_v5 = vsub.s32 0, %v93_v4  ;;  %v98_v7 = vsub.s32 1, %v93_v4 }
  0x27   :  { %108 = vmatprep.subr.mxu0 %v83_v8  ;;  %344 = vmatpush3.msra.mxu1 %v190_v17  ;;  %v204_v22 = vld [vmem:[#allocation6 + $0xe8] sm:$0xff]  ;;  %v73_v23 = vld [vmem:[#allocation3 + $0x78] sm:$0xff]  ;;  %v72_v25 = vld [vmem:[#allocation3 + $0x70] sm:$0xff] }
  0x28   :  { %109 = vmatpush1.msra.mxu0 %v82_v9  ;;  %345 = vmatprep.subr.mxu1 %v205_v18  ;;  %v188_v24 = vld [vmem:[#allocation6 + $0x68] sm:$0xff]  ;;  %v203_v26 = vld [vmem:[#allocation6 + $0xe0] sm:$0xff]  ;;  %v202_v30 = vld [vmem:[#allocation6 + $0xd8] sm:$0xff] }
  0x29   :  { %110 = vmatprep.subr.mxu0 %v81_v10  ;;  %346 = vmatpush3.msra.mxu1 %v189_v20  ;;  %v71_v27 = vld [vmem:[#allocation3 + $0x68] sm:$0xff]  ;;  %v187_v28 = vld [vmem:[#allocation6 + $0x60] sm:$0xff]  ;;  %v69_v31 = vld [vmem:[#allocation3 + $0x58] sm:$0xff] }
  0x2a   :  { %111 = vmatpush1.msra.mxu0 %v80_v11  ;;  %347 = vmatprep.subr.mxu1 %v204_v22  ;;  %v70_v29 = vld [vmem:[#allocation3 + $0x60] sm:$0xff]  ;;  %v186_v32 = vld [vmem:[#allocation6 + $0x58] sm:$0xff]  ;;  %v68_v33 = vld [vmem:[#allocation3 + $0x50] sm:$0xff] }
  0x2b   :  { %112 = vmatprep.subr.mxu0 %v79_v12  ;;  %348 = vmatpush3.msra.mxu1 %v188_v24  ;;  %v201_v34 = vld [vmem:[#allocation6 + $0xd0] sm:$0xff]  ;;  %v67_v35 = vld [vmem:[#allocation3 + $0x48] sm:$0xff]  ;;  %v66_v37 = vld [vmem:[#allocation3 + $0x40] sm:$0xff]  ;;  %v465_v24 = vmov 0  }
  0x2c   :  { %113 = vmatpush1.msra.mxu0 %v78_v13  ;;  %349 = vmatprep.subr.mxu1 %v203_v26  ;;  %v185_v36 = vld [vmem:[#allocation6 + $0x50] sm:$0xff]  ;;  %v200_v38 = vld [vmem:[#allocation6 + $0xc8] sm:$0xff]  ;;  %v65_v39 = vld [vmem:[#allocation3 + $0x38] sm:$0xff] }
  0x2d   :  { %114 = vmatprep.subr.mxu0 %v77_v14  ;;  %350 = vmatpush3.msra.mxu1 %v187_v28  ;;  %v184_v40 = vld [vmem:[#allocation6 + $0x48] sm:$0xff]  ;;  %v64_v41 = vld [vmem:[#allocation3 + $0x30] sm:$0xff]  ;;  %v199_v42 = vld [vmem:[#allocation6 + $0xc0] sm:$0xff] }
  0x2e   :  { %115 = vmatpush1.msra.mxu0 %v76_v15  ;;  %351 = vmatprep.subr.mxu1 %v202_v30  ;;  %v63_v43 = vld [vmem:[#allocation3 + $0x28] sm:$0xff]  ;;  %v183_v44 = vld [vmem:[#allocation6 + $0x40] sm:$0xff]  ;;  %v198_v46 = vld [vmem:[#allocation6 + $0xb8] sm:$0xff] }
  0x2f   :  { %116 = vmatprep.subr.mxu0 %v75_v19  ;;  %352 = vmatpush3.msra.mxu1 %v186_v32  ;;  %v62_v45 = vld [vmem:[#allocation3 + $0x20] sm:$0xff]  ;;  %v61_v47 = vld [vmem:[#allocation3 + $0x18] sm:$0xff]  ;;  %v60_v49 = vld [vmem:[#allocation3 + $0x10] sm:$0xff] }
  0x30   :  { %117 = vmatpush1.msra.mxu0 %v74_v21  ;;  %353 = vmatprep.subr.mxu1 %v201_v34  ;;  %v182_v48 = vld [vmem:[#allocation6 + $0x38] sm:$0xff]  ;;  %v197_v50 = vld [vmem:[#allocation6 + $0xb0] sm:$0xff]  ;;  %v59_v51 = vld [vmem:[#allocation3 + $0x8] sm:$0xff] }
  0x31   :  { %118 = vmatprep.subr.mxu0 %v73_v23  ;;  %354 = vmatpush3.msra.mxu1 %v185_v36  ;;  %v181_v52 = vld [vmem:[#allocation6 + $0x30] sm:$0xff]  ;;  %v58_v53 = vld [vmem:[#allocation3] sm:$0xff]  ;;  %v196_v54 = vld [vmem:[#allocation6 + $0xa8] sm:$0xff] }
  0x32   :  { %119 = vmatpush1.msra.mxu0 %v72_v25  ;;  %355 = vmatprep.subr.mxu1 %v200_v38  ;;  %v57_v55 = vld [vmem:[%s531_s0] sm:$0xff]  ;;  %v180_v56 = vld [vmem:[#allocation6 + $0x28] sm:$0xff]  ;;  %v193_v61 = vld [vmem:[#allocation6 + $0x90] sm:$0xff] }
  0x33   :  { %120 = vmatprep.subr.mxu0 %v71_v27  ;;  %356 = vmatpush3.msra.mxu1 %v184_v40  ;;  %v195_v57 = vld [vmem:[#allocation6 + $0xa0] sm:$0xff]  ;;  %v194_v59 = vld [vmem:[#allocation6 + $0x98] sm:$0xff]  ;;  %v177_v62 = vld [vmem:[#allocation6 + $0x10] sm:$0xff] }
  0x34   :  { %121 = vmatpush1.msra.mxu0 %v70_v29  ;;  %357 = vmatprep.subr.mxu1 %v199_v42  ;;  %v179_v58 = vld [vmem:[#allocation6 + $0x20] sm:$0xff]  ;;  %v178_v60 = vld [vmem:[#allocation6 + $0x18] sm:$0xff]  ;;  %v192_v63 = vld [vmem:[#allocation6 + $0x88] sm:$0xff] }
  0x35   :  { %122 = vmatprep.subr.mxu0 %v69_v31  ;;  %358 = vmatpush3.msra.mxu1 %v183_v44  ;;  %v176_v0 = vld [vmem:[#allocation6 + $0x8] sm:$0xff]  ;;  %v191_v1 = vld [vmem:[#allocation6 + $0x80] sm:$0xff]  ;;  %v339_v18 = vld [vmem:[%s535_s4] ss:$0 sm:$0xff]  ;;  %s466_s4 = smov [#allocation8]  }
  0x36   :  { %123 = vmatpush1.msra.mxu0 %v68_v33  ;;  %359 = vmatprep.subr.mxu1 %v198_v46  ;;  %v175_v2 = vld [vmem:[#allocation6] sm:$0xff]  ;;  %v340_v21 = vld [vmem:[%s536_s5] ss:$0 sm:$0xff]  ;;  %v315_v33 = vand.u32 127, %v92_v3  ;;  %s329_s5 = sshll.u32 %s466_s4, 4  ;;  %s330_s5 = int_to_ptr.vmem [resolvable:$true] %s329_s5 }
  0x37   :  { %124 = vmatprep.subr.mxu0 %v67_v35  ;;  %360 = vmatpush3.msra.mxu1 %v182_v48  ;;  %v90_v6 = vld [vmem:[%s533_s2] sm:$0x3]  ;;  %s432_s20 = scalar_lea.vmem %s330_s5, 16  ;;  %s436_s21 = scalar_lea.vmem %s330_s5, 32 }
  0x38   :  { %125 = vmatpush1.msra.mxu0 %v66_v37  ;;  %361 = vmatprep.subr.mxu1 %v197_v50  ;;  %v95_v8 = vrot.slane %v90_v6, %v94_v5  ;;  %v99_v9 = vrot.slane %v90_v6, %v98_v7  ;;  %v341_v25 = vld [vmem:[#allocation2] ss:$0 sm:$0xff]  ;;  %v318_v34 = vsub.s32 %v315_v33, %v93_v4  ;;  %p433_p10 = scmp.ne.s32.totalorder %s330_s5, %s432_s20  ;;  %p437_p11 = scmp.lt.s32.totalorder %s330_s5, %s330_s5 }
  0x39   :  { %126 = vmatprep.subr.mxu0 %v65_v39  ;;  %362 = vmatpush3.msra.mxu1 %v181_v52  ;;  %p438_p12 = scmp.lt.s32.totalorder %s436_s21, %s432_s20 }
  0x3a   :  { %127 = vmatpush1.msra.mxu0 %v64_v41  ;;  %363 = vmatprep.subr.mxu1 %v196_v54 }
  0x3b   :  { %128 = vmatprep.subr.mxu0 %v63_v43  ;;  %364 = vmatpush3.msra.mxu1 %v180_v56  ;;  %p439_p13 = por %p438_p12, %p437_p11 }
  0x3c   :  { %129 = vmatpush1.msra.mxu0 %v62_v45  ;;  %365 = vmatprep.subr.mxu1 %v195_v57 }
  0x3d   :  { %130 = vmatprep.subr.mxu0 %v61_v47  ;;  %366 = vmatpush3.msra.mxu1 %v179_v58  ;;  %p440_p0 = pnand %p439_p13, %p433_p10 }
  0x3e   :  { %131 = vmatpush1.msra.mxu0 %v60_v49  ;;  %367 = vmatprep.subr.mxu1 %v194_v59 }
  0x3f   :  { %132 = vmatprep.subr.mxu0 %v59_v51  ;;  %368 = vmatpush3.msra.mxu1 %v178_v60 }
  0x40   :  { %133 = vmatpush1.msra.mxu0 %v58_v53  ;;  %369 = vmatprep.subr.mxu1 %v193_v61 }
  0x41   :  { %167 = vmatmul.mubr.f32.vlgmr.msra.gmra.mxu0 %v57_v55  ;;  %370 = vmatpush3.msra.mxu1 %v177_v62 }
  0x42   :  { %371 = vmatprep.subr.mxu1 %v192_v63  ;;  %387 = vset.pattern.permute.xlu0 %v465_v24 }
  0x43   :  { %372 = vmatpush3.msra.mxu1 %v176_v0 }
  0x44   :  { %373 = vmatprep.subr.mxu1 %v191_v1 }
  0x45   :  { %374 = vmatpush3.msra.mxu1 %v175_v2 }
 0x101   :  { %v168_v10 = vpop.f32.mrf.mxu0 }
 0x102   :  { %v169_v11 = vadd.f32 %v168_v10, %v95_v8 }
 0x103   :  { %v170_v12 = vpop.f32.mrf.mxu0 }
 0x104   :  { %v171_v13 = vadd.f32 %v170_v12, %v99_v9  ;;  %v173_v15 = vmax.f32 %v169_v11, 0.0 }
 0x106   :  { %v174_v14 = vmax.f32 %v171_v13, 0.0 }
 0x108   :  { %278 = vmatprep.mubr.f32.mxu1 %v174_v14 }
 0x109   :  { %279 = vmatmul.mubr.f32.vlgmr.msra.gmra.mxu1 %v173_v15 }
 0x1c9   :  { %v375_v16 = vpop.f32.mrf.mxu1 }
 0x1cb   :  { %v376_v17 = vpop.f32.mrf.mxu1 }
 0x1cc   :  { %v377_v19 = vadd.f32 %v376_v17, %v375_v16 }
 0x1ce   :  { %v281_v20 = vadd.f32 %v377_v19, %v339_v18 }
 0x1d0   :  { %v284_v22 = vmax.f32 %v281_v20, 0.0 }
 0x1d2   :  { %v292_v23 = vmul.f32 %v340_v21, %v284_v22 }
 0x1d4   :  { %293 = vadd.xlane.f32.xlu0 %v292_v23 }
 0x25d   :  { %v294_v26 = vpop.xlane.xlu0 %293 }
 0x25e   :  { %v302_v27 = vadd.f32 %v341_v25, %v294_v26 }
 0x260   :  { %v342_v28 = vmul.f32 -1.442695, %v302_v27 }
 0x262   :  { %388 = vpow2.f32 %v342_v28 }
 0x26f   :  { %v389_v29 = vpop.eup %388 }
 0x270   :  { %v306_v30 = vadd.f32 1.0, %v389_v29 }
 0x272   :  { %390 = vrcp.f32 %v306_v30 }
 0x27f   :  { %v391_v31 = vpop.eup %390 }
 0x280   :  { %v309_v32 = vmul.f32 360.0, %v391_v31 }
 0x282   :  { %312 = vperm.xlu0 %387, %v309_v32  }
 0x2fd   :  { %v313_v35 = vpop.permute.xlu0 %312 }
 0x2fe   :  { %v319_v36 = vrot.slane %v313_v35, %v318_v34 }
 0x300   :  { %322 = vst.msk [vmem:[#allocation8] sm:$0x1] %vm321_vm0, %v319_v36 }
 0x301   :  { %443 = shalt.err (!%p440_p0)
}
 0x302   :  { %332 = dma.vmem_to_hbm [thread:$0]  %s330_s5, 16, %s538_s7, [#allocation5]  }
 0x303   :  { %456 = dma.done.wait [#allocation5], 16  }
 0x304   :  { %457 = vsyncadd [#allocation5], 4294967280 }
 0x305   :  { %336 = vsyncpa [#allocation4], 1 }
 0x306   :  { %337 = vsyncpa [#allocation7], 1 }
 0x307   :  { %338 = vsyncpa [#allocation5], 1 }

</bundles_post_ra>
